<compile_context>
chip_gen: v5e
topology: v5e:2x2
jax: 0.10.0
libtpu: 0.0.40
codegen_flags: <defaults>
</compile_context>

<pallas_src>
import math

import jax
import jax.numpy as jnp
from jax import lax
from jax.experimental import pallas as pl
from jax.experimental.pallas import tpu as pltpu


NUM_PARTIALS = 2        # leading "parallel" grid axis (2 TensorCores on v7x)
_LANE_FOLD = 512        # lane width used when the natural last dim is unsuitable
_MAX_CHUNK_ROWS = 256   # rows processed per inner fori_loop iteration


def _cdiv(a, b):
    return (a + b - 1) // b


def _round_up(x, m):
    return _cdiv(x, m) * m


def _make_masked_mse_kernel(block_rows, chunk, lanes):
    """Kernel over a (block_rows, lanes) tile; accumulates into (8, lanes) outputs."""
    n_chunks = block_rows // chunk

    def kernel(pred_ref, true_ref, mask_ref, num_ref, den_ref):
        i = pl.program_id(1)  # reduction ("arbitrary") axis

        @pl.when(i == 0)
        def _init():
            num_ref[...] = jnp.zeros_like(num_ref)
            den_ref[...] = jnp.zeros_like(den_ref)

        def accum(p_raw, t_raw, m_raw):
            p = p_raw.astype(jnp.float32)
            t = t_raw.astype(jnp.float32)
            m = m_raw.astype(jnp.float32)          # mask.float()
            d = p - t
            sq = d * d * m
            # Fold the chunk's rows onto the 8-sublane accumulator.  Axis 0 of
            # the reshape is the *major* axis, so this is a pure VALU vreg-add
            # tree -- no per-step XLU cross-lane reduction, ~zero store traffic.
            num_ref[...] += jnp.sum(sq.reshape(chunk // 8, 8, lanes), axis=0)
            den_ref[...] += jnp.sum(m.reshape(chunk // 8, 8, lanes), axis=0)

        if n_chunks == 1:
            accum(pred_ref[...], true_ref[...], mask_ref[...])
        else:
            def body(c, carry):
                r0 = pl.multiple_of(c * chunk, chunk)
                sl = pl.ds(r0, chunk)
                accum(pred_ref[sl, :], true_ref[sl, :], mask_ref[sl, :])
                return carry

            lax.fori_loop(0, n_chunks, body, 0)

    return kernel


def _vmem_capacity_bytes():
    try:
        return int(pltpu.get_tpu_info().vmem_capacity_bytes)
    except Exception:
        return 64 * 1024 * 1024  # conservative default (v7x-sized VMEM)


def masked_mse_loss(pred, true, mask):
    """Pallas TPU masked MSE: sum((pred.squeeze()-true)**2 * mask) / (sum(mask)+1e-8)."""
    # --- glue, mirroring the PyTorch forward --------------------------------
    pred = jnp.squeeze(pred)  # torch pred.squeeze(): drops ALL singleton dims
    # Broadcasting matches the reference for the usual case where mask/true
    # already have the full shape (mask.sum() is then identical either way).
    shape = jnp.broadcast_shapes(pred.shape, true.shape, mask.shape)
    pred = jnp.broadcast_to(pred, shape)
    true = jnp.broadcast_to(true, shape)
    mask = jnp.broadcast_to(mask, shape)
    if mask.dtype == jnp.bool_:
        mask = mask.astype(jnp.int8)  # cheap HBM bytes; kernel upcasts to f32

    n_elems = int(math.prod(shape))

    # --- present a lane-dense 2-D (rows, lanes) plane ------------------------
    if len(shape) >= 2 and shape[-1] % 128 == 0 and 128 <= shape[-1] <= 2048:
        # Natural layout: collapsing leading dims is free (lanes stay last).
        lanes = int(shape[-1])
        rows_needed = n_elems // lanes
        pred2 = pred.reshape(rows_needed, lanes)
        true2 = true.reshape(rows_needed, lanes)
        mask2 = mask.reshape(rows_needed, lanes)
        lane_folded = False
    else:
        # Lane folding: fixed multiple-of-128 lane width keeps every vector op
        # unmasked and makes block sizing purely byte-driven (ragged / huge /
        # tiny last dims all become well-formed tiles).
        lanes = _LANE_FOLD
        rows_needed = max(1, _cdiv(n_elems, lanes))
        pred2 = pred.reshape(-1)
        true2 = true.reshape(-1)
        mask2 = mask.reshape(-1)
        lane_folded = True

    # --- generation-dependent block sizing -----------------------------------
    vmem_cap = _vmem_capacity_bytes()
    if vmem_cap >= 96 * 1024 * 1024:        # v5e / v6e: 128 MiB physical VMEM
        target_block_bytes = 16 * 1024 * 1024
        vmem_limit_bytes = 64 * 1024 * 1024
    else:                                   # v7x: 64 MiB VMEM per TensorCore
        target_block_bytes = 10 * 1024 * 1024
        vmem_limit_bytes = 44 * 1024 * 1024

    bytes_per_row = lanes * (pred2.dtype.itemsize + true2.dtype.itemsize +
                             mask2.dtype.itemsize)
    raw_block_rows = max(32, target_block_bytes // max(bytes_per_row, 1))
    tiles_per_partial = max(1, _cdiv(rows_needed, NUM_PARTIALS * raw_block_rows))
    total_tiles = NUM_PARTIALS * tiles_per_partial
    # Spread rows evenly over the tiles (avoids a nearly-empty padded tile).
    block_rows = max(32, _round_up(_cdiv(rows_needed, total_tiles), 8))
    if block_rows > _MAX_CHUNK_ROWS:
        chunk = _MAX_CHUNK_ROWS
        block_rows = _round_up(block_rows, chunk)
    else:
        chunk = block_rows
    rows_padded = total_tiles * block_rows
    assert block_rows % chunk == 0 and chunk % 8 == 0 and lanes % 128 == 0

    # --- zero-pad the tail (padded mask == 0, so the result is exact) --------
    if lane_folded:
        pad = rows_padded * lanes - n_elems
        if pad:
            pred2 = jnp.pad(pred2, (0, pad))
            true2 = jnp.pad(true2, (0, pad))
            mask2 = jnp.pad(mask2, (0, pad))
        pred2 = pred2.reshape(rows_padded, lanes)
        true2 = true2.reshape(rows_padded, lanes)
        mask2 = mask2.reshape(rows_padded, lanes)
    elif rows_padded != rows_needed:
        pad = ((0, rows_padded - rows_needed), (0, 0))
        pred2 = jnp.pad(pred2, pad)
        true2 = jnp.pad(true2, pad)
        mask2 = jnp.pad(mask2, pad)

    # --- pallas_call ----------------------------------------------------------
    tpp = tiles_per_partial
    in_spec = pl.BlockSpec((block_rows, lanes), lambda p, i: (p * tpp + i, 0))
    # Per-core partial accumulators as outputs; resident across the reduction
    # axis, written back once per parallel index.
    acc_spec = pl.BlockSpec((None, 8, lanes), lambda p, i: (p, 0, 0))

    num_parts, den_parts = pl.pallas_call(
        _make_masked_mse_kernel(block_rows, chunk, lanes),
        out_shape=(
            jax.ShapeDtypeStruct((NUM_PARTIALS, 8, lanes), jnp.float32),
            jax.ShapeDtypeStruct((NUM_PARTIALS, 8, lanes), jnp.float32),
        ),
        grid_spec=pltpu.PrefetchScalarGridSpec(
            num_scalar_prefetch=0,
            grid=(NUM_PARTIALS, tiles_per_partial),
            in_specs=[in_spec, in_spec, in_spec],
            out_specs=[acc_spec, acc_spec],
        ),
        compiler_params=pltpu.CompilerParams(
            dimension_semantics=("parallel", "arbitrary"),
            vmem_limit_bytes=vmem_limit_bytes,
        ),
    )(pred2, true2, mask2)

    # Tiny final combine in XLA: (num0 + num1) / (den0 + den1 + 1e-8).
    num = jnp.sum(num_parts)
    den = jnp.sum(den_parts)
    return num / (den + jnp.float32(1e-8))


if __name__ == "__main__":
    key = jax.random.PRNGKey(0)
    k1, k2, k3 = jax.random.split(key, 3)

    # Case 1: (B, S, 1) f32 regression-head pred, int8 mask (narrow dtype to
    # cut HBM bytes), lane-aligned last dim (natural-layout path).
    B, S = 16, 128
    pred = jax.random.normal(k1, (B, S, 1), dtype=jnp.float32)
    true = jax.random.normal(k2, (B, S), dtype=jnp.float32)
    mask = (jax.random.uniform(k3, (B, S)) > 0.3).astype(jnp.int8)

    loss = jax.block_until_ready(masked_mse_loss(pred, true, mask))

    p = jnp.squeeze(pred, axis=-1)
    m = mask.astype(jnp.float32)
    ref = jnp.sum(((p - true) ** 2) * m) / (jnp.sum(m) + 1e-8)
    assert jnp.allclose(loss, ref, rtol=1e-5, atol=1e-6), (loss, ref)

    # Case 2: ragged last dim (exercises the lane-folding + zero-padding path),
    # bf16 inputs (upcast to f32 inside the kernel), float mask.
    k4, k5, k6 = jax.random.split(jax.random.PRNGKey(1), 3)
    B2, S2 = 10, 96
    pred2 = jax.random.normal(k4, (B2, S2), dtype=jnp.bfloat16)
    true2 = jax.random.normal(k5, (B2, S2), dtype=jnp.bfloat16)
    mask2 = (jax.random.uniform(k6, (B2, S2)) > 0.5).astype(jnp.float32)

    loss2 = jax.block_until_ready(masked_mse_loss(pred2, true2, mask2))

    p2 = pred2.astype(jnp.float32)
    t2 = true2.astype(jnp.float32)
    ref2 = jnp.sum(((p2 - t2) ** 2) * mask2) / (jnp.sum(mask2) + 1e-8)
    assert jnp.allclose(loss2, ref2, rtol=1e-3, atol=1e-5), (loss2, ref2)

    print("KERNEL_OK")
</pallas_src>

<mosaic_0001>
module attributes {stable_mosaic.version = 11 : i64} {
  func.func @kernel(%arg0: i32, %arg1: i32, %arg2: memref<32x128xf32, #tpu.memory_space<vmem>>, %arg3: memref<32x128xf32, #tpu.memory_space<vmem>>, %arg4: memref<32x128xi8, #tpu.memory_space<vmem>>, %arg5: memref<1x8x128xf32, #tpu.memory_space<vmem>>, %arg6: memref<1x8x128xf32, #tpu.memory_space<vmem>>) attributes {dimension_semantics = [#tpu.dimension_semantics<parallel>, #tpu.dimension_semantics<arbitrary>], iteration_bounds = array<i64: 2, 1>, scalar_prefetch = 0 : i64, scratch_operands = 0 : i64, tpu.core_type = #tpu.core_type<tc>, window_params = [{transform_indices = @transform_0, window_bounds = array<i64: 32, 128>}, {transform_indices = @transform_1, window_bounds = array<i64: 32, 128>}, {transform_indices = @transform_2, window_bounds = array<i64: 32, 128>}, {transform_indices = @transform_3, window_bounds = array<i64: 1, 8, 128>}, {transform_indices = @transform_4, window_bounds = array<i64: 1, 8, 128>}]} {
    %c0_i32 = arith.constant 0 : i32
    %0 = arith.cmpi eq, %arg1, %c0_i32 : i32
    %1 = arith.extui %0 : i1 to i32
    %c0_i32_0 = arith.constant 0 : i32
    %2 = arith.cmpi ne, %1, %c0_i32_0 : i32
    scf.if %2 {
      %cst_19 = arith.constant 0.000000e+00 : f32
      %26 = vector.broadcast %cst_19 : f32 to vector<8x128xf32>
      %c0_20 = arith.constant 0 : index
      %c0_21 = arith.constant 0 : index
      %c0_22 = arith.constant 0 : index
      %27 = vector.load %arg5[%c0_20, %c0_21, %c0_22] : memref<1x8x128xf32, #tpu.memory_space<vmem>>, vector<1x8x128xf32>
      %28 = vector.shape_cast %27 : vector<1x8x128xf32> to vector<8x128xf32>
      %29 = vector.shape_cast %26 : vector<8x128xf32> to vector<1x8x128xf32>
      tpu.vector_store %arg5[%c0_20, %c0_21, %c0_22], %29 {strides = array<i32>} : memref<1x8x128xf32, #tpu.memory_space<vmem>>, vector<1x8x128xf32>,
      %cst_23 = arith.constant 0.000000e+00 : f32
      %30 = vector.broadcast %cst_23 : f32 to vector<8x128xf32>
      %c0_24 = arith.constant 0 : index
      %c0_25 = arith.constant 0 : index
      %c0_26 = arith.constant 0 : index
      %31 = vector.load %arg6[%c0_24, %c0_25, %c0_26] : memref<1x8x128xf32, #tpu.memory_space<vmem>>, vector<1x8x128xf32>
      %32 = vector.shape_cast %31 : vector<1x8x128xf32> to vector<8x128xf32>
      %33 = vector.shape_cast %30 : vector<8x128xf32> to vector<1x8x128xf32>
      tpu.vector_store %arg6[%c0_24, %c0_25, %c0_26], %33 {strides = array<i32>} : memref<1x8x128xf32, #tpu.memory_space<vmem>>, vector<1x8x128xf32>,
    } else {
    }
    %c0 = arith.constant 0 : index
    %c0_1 = arith.constant 0 : index
    %3 = vector.load %arg2[%c0, %c0_1] : memref<32x128xf32, #tpu.memory_space<vmem>>, vector<32x128xf32>
    %c0_2 = arith.constant 0 : index
    %c0_3 = arith.constant 0 : index
    %4 = vector.load %arg3[%c0_2, %c0_3] : memref<32x128xf32, #tpu.memory_space<vmem>>, vector<32x128xf32>
    %c0_4 = arith.constant 0 : index
    %c0_5 = arith.constant 0 : index
    %5 = vector.load %arg4[%c0_4, %c0_5] : memref<32x128xi8, #tpu.memory_space<vmem>>, vector<32x128xi8>
    %6 = arith.sitofp %5 : vector<32x128xi8> to vector<32x128xf32>
    %7 = arith.subf %3, %4 : vector<32x128xf32>
    %8 = arith.mulf %7, %7 : vector<32x128xf32>
    %9 = arith.mulf %8, %6 : vector<32x128xf32>
    %c0_6 = arith.constant 0 : index
    %c0_7 = arith.constant 0 : index
    %c0_8 = arith.constant 0 : index
    %10 = vector.load %arg5[%c0_6, %c0_7, %c0_8] : memref<1x8x128xf32, #tpu.memory_space<vmem>>, vector<1x8x128xf32>
    %11 = vector.shape_cast %10 : vector<1x8x128xf32> to vector<8x128xf32>
    %12 = vector.shape_cast %9 : vector<32x128xf32> to vector<4x8x128xf32>
    %cst = arith.constant dense<0.000000e+00> : vector<8x128xf32>
    %13 = vector.multi_reduction <add>, %12, %cst [0] : vector<4x8x128xf32> to vector<8x128xf32>
    %14 = arith.addf %11, %13 : vector<8x128xf32>
    %c0_9 = arith.constant 0 : index
    %c0_10 = arith.constant 0 : index
    %c0_11 = arith.constant 0 : index
    %15 = vector.load %arg5[%c0_9, %c0_10, %c0_11] : memref<1x8x128xf32, #tpu.memory_space<vmem>>, vector<1x8x128xf32>
    %16 = vector.shape_cast %15 : vector<1x8x128xf32> to vector<8x128xf32>
    %17 = vector.shape_cast %14 : vector<8x128xf32> to vector<1x8x128xf32>
    tpu.vector_store %arg5[%c0_9, %c0_10, %c0_11], %17 {strides = array<i32>} : memref<1x8x128xf32, #tpu.memory_space<vmem>>, vector<1x8x128xf32>,
    %c0_12 = arith.constant 0 : index
    %c0_13 = arith.constant 0 : index
    %c0_14 = arith.constant 0 : index
    %18 = vector.load %arg6[%c0_12, %c0_13, %c0_14] : memref<1x8x128xf32, #tpu.memory_space<vmem>>, vector<1x8x128xf32>
    %19 = vector.shape_cast %18 : vector<1x8x128xf32> to vector<8x128xf32>
    %20 = vector.shape_cast %6 : vector<32x128xf32> to vector<4x8x128xf32>
    %cst_15 = arith.constant dense<0.000000e+00> : vector<8x128xf32>
    %21 = vector.multi_reduction <add>, %20, %cst_15 [0] : vector<4x8x128xf32> to vector<8x128xf32>
    %22 = arith.addf %19, %21 : vector<8x128xf32>
    %c0_16 = arith.constant 0 : index
    %c0_17 = arith.constant 0 : index
    %c0_18 = arith.constant 0 : index
    %23 = vector.load %arg6[%c0_16, %c0_17, %c0_18] : memref<1x8x128xf32, #tpu.memory_space<vmem>>, vector<1x8x128xf32>
    %24 = vector.shape_cast %23 : vector<1x8x128xf32> to vector<8x128xf32>
    %25 = vector.shape_cast %22 : vector<8x128xf32> to vector<1x8x128xf32>
    tpu.vector_store %arg6[%c0_16, %c0_17, %c0_18], %25 {strides = array<i32>} : memref<1x8x128xf32, #tpu.memory_space<vmem>>, vector<1x8x128xf32>,
    return
  }
  func.func @transform_0(%arg0: i32, %arg1: i32) -> (i32, i32) {
    %c1_i32 = arith.constant 1 : i32
    %0 = arith.muli %arg0, %c1_i32 : i32
    %1 = arith.addi %0, %arg1 : i32
    %c0_i32 = arith.constant 0 : i32
    %c0_i32_0 = arith.constant 0 : i32
    return %1, %c0_i32 : i32, i32
  }
  func.func @transform_1(%arg0: i32, %arg1: i32) -> (i32, i32) {
    %c1_i32 = arith.constant 1 : i32
    %0 = arith.muli %arg0, %c1_i32 : i32
    %1 = arith.addi %0, %arg1 : i32
    %c0_i32 = arith.constant 0 : i32
    %c0_i32_0 = arith.constant 0 : i32
    return %1, %c0_i32 : i32, i32
  }
  func.func @transform_2(%arg0: i32, %arg1: i32) -> (i32, i32) {
    %c1_i32 = arith.constant 1 : i32
    %0 = arith.muli %arg0, %c1_i32 : i32
    %1 = arith.addi %0, %arg1 : i32
    %c0_i32 = arith.constant 0 : i32
    %c0_i32_0 = arith.constant 0 : i32
    return %1, %c0_i32 : i32, i32
  }
  func.func @transform_3(%arg0: i32, %arg1: i32) -> (i32, i32, i32) {
    %c0_i32 = arith.constant 0 : i32
    %c0_i32_0 = arith.constant 0 : i32
    %c0_i32_1 = arith.constant 0 : i32
    return %arg0, %c0_i32, %c0_i32_0 : i32, i32, i32
  }
  func.func @transform_4(%arg0: i32, %arg1: i32) -> (i32, i32, i32) {
    %c0_i32 = arith.constant 0 : i32
    %c0_i32_0 = arith.constant 0 : i32
    %c0_i32_1 = arith.constant 0 : i32
    return %arg0, %c0_i32, %c0_i32_0 : i32, i32, i32
  }
}

</mosaic_0001>

<bundles_post_ra>
// kernel: tpu_custom_call.1
= control target key start
LH: loop header
LB: loop body
LE: loop exit
PB: predicated region body
PF: predicated region fallthrough
CT: control target
= control target key end

     0   :  { %s1099_s0 = inlined_call_operand.hbm [shape: f32[64,128], index: 0, kind: input, shape index: {}]   ;;  %s1100_s1 = inlined_call_operand.hbm [shape: f32[64,128], index: 1, kind: input, shape index: {}]   ;;  %s1101_s2 = inlined_call_operand.hbm [shape: s8[64,128], index: 2, kind: input, shape index: {}]   ;;  %s1102_s3 = inlined_call_operand.hbm [shape: f32[2,8,128], index: 3, kind: output, shape index: {0}]   ;;  %s1103_s4 = inlined_call_operand.hbm [shape: f32[2,8,128], index: 4, kind: output, shape index: {1}]  }
   0x1   :  { %1113 = sst [smem:[#allocation22_spill]] %s1100_s1 }
   0x2   :  { %1114 = sst [smem:[#allocation23_spill]] %s1102_s3 }
   0x3   :  { %10 = vsyncpa [#allocation3], 0 }
   0x4   :  { %12 = vsyncpa [#allocation3 + $0x1], 0 }
   0x5   :  { %13 = vsyncpa [#allocation6], 0 }
   0x6   :  { %15 = vsyncpa [#allocation6 + $0x1], 0 }
   0x7   :  { %16 = vsyncpa [#allocation4], 0 }
   0x8   :  { %18 = vsyncpa [#allocation4 + $0x1], 0 }
   0x9   :  { %19 = vsyncpa [#allocation10], 0 }
   0xa   :  { %21 = vsyncpa [#allocation10 + $0x1], 0  ;;  %s915_s15 = smov 0   ;;  %s917_s16 = smov 0  }
   0xb   :  { %s919_s17 = smov 0   ;;  %s921_s18 = smov 0  }
   0xc   :  { %s923_s19 = smov 0   ;;  %s925_s20 = smov 0  }
   0xd LB: > { %1115 = sst [smem:[#allocation15_spill]] %s866_s15  ;;  %s946_s21 = sadd.s32 4294967295, %s886_s20   ;;  %s886_s20 = sphi %s925_s20, %s27_s20   ;;  %s882_s19 = sphi %s923_s19, %s1140_s19   ;;  %s878_s18 = sphi %s921_s18, %s1139_s18   ;;  %s874_s17 = sphi %s919_s17, %s1135_s17   ;;  %s870_s16 = sphi %s917_s16, %s1138_s16   ;;  %s866_s15 = sphi %s915_s15, %s1137_s15  }
   0xe   : > { %1116 = sst [smem:[#allocation16_spill]] %s874_s17  ;;  %s573_s22 = sadd.s32 4294967294, %s886_s20  }
   0xf   : > { %1117 = sst [smem:[#allocation17_spill]] %s886_s20  ;;  %s39_s23 = sadd.s32 1, %s882_s19 }
  0x10   : > { %s48_s24 = sadd.s32 1, %s874_s17  ;;  %p41_p0 = scmp.ge.s32.totalorder %s39_s23, 2 }
  0x11   : > { %p55_p1 = scmp.ne.s32.totalorder %s874_s17, %s870_s16  ;;  %p56_p2 = scmp.eq.s32.totalorder %s886_s20, 0 }
  0x12   : > { %p61_p3 = scmp.ne.s32.totalorder %s870_s16, %s866_s15  ;;  %s1142_s23 = smov (%p41_p0, %s39_s23), 0 }
  0x13   : > { %1118 = sst [smem:[#allocation18_spill]] %s1142_s23  ;;  %p958_p4 = por %p56_p2, %p55_p1 }
  0x14   : > { %p62_p5 = scmp.eq.s32.totalorder %s946_s21, 0  ;;  %s45_s26 = ssub.s32 %s882_s19, %s1142_s23 }
  0x15   : > { %p141_p6 = scmp.eq.s32.totalorder %s946_s21, 1  ;;  %p46_p7 = scmp.eq.s32.totalorder %s45_s26, 0 }
  0x16   : > { %p966_p8 = por %p62_p5, %p61_p3  ;;  %p147_p10 = scmp.eq.s32.totalorder %s573_s22, 1 }
  0x17   : > { %p970_p9 = por %p141_p6, %p55_p1  ;;  %p575_p12 = scmp.ge.s32.totalorder %s886_s20, 2 }
  0x18   : > { %s975_s29 = scalar_select %p46_p7, %s874_s17, %s48_s24  }
  0x19   : > { %s1121_s28 = scalar_select %p970_p9, 1, 0 }
  0x1a   : > { %1123 = sst [smem:[#allocation20_spill]] %s975_s29  ;;  %p977_p11 = por %p147_p10, %p61_p3 }
  0x1b   : > { %1122 = sst [smem:[#allocation19_spill]] %s1121_s28  ;;  %p625_p13 = scmp.lt.s32.totalorder %s886_s20, 2 }
  0x1c   : > { %s1124_s30 = scalar_select %p977_p11, 1, 0 }
  0x1d   : > { %s984_s5 = sand.u32 1, %s874_s17   ;;  %s596_s7 = sshll.u32 %s882_s19, 5 }
  0x1e   : > { %1125 = sst [smem:[#allocation21_spill]] %s1124_s30  ;;  %s576_s6 = sshll.u32 %s984_s5, 5 }
  0x1f   : > { %p990_p0 = pnand %p625_p13, %p958_p4  ;;  %s216_s9 = sand.u32 1, %s886_s20  }
  0x20   : > { %s1127_s1 = sld [smem:[#allocation22_spill]]  ;;  %s220_s14 = scalar_lea.vmem [#allocation5], %s576_s6 }
  0x21   : > { %s229_s22 = sshll.u32 %s220_s14, 4  ;;  %s217_s24 = scalar_lea.sflag [#allocation6], %s216_s9  ;;  %s230_s22 = int_to_ptr.vmem [resolvable:$true] %s229_s22 }
  0x22   : > { %s888_s25 = smov 128   ;;  %s889_s26 = smov 8  }
  0x23   : > { %p584_p1 = scmp.ge.s32.totalorder %s886_s20, 1  ;;  %p257_p2 = scmp.lt.s32.totalorder %s886_s20, 3 }
  0x24   : > { %s194_s9 = scalar_lea.sflag [#allocation3], %s984_s5 }
  0x25   : > { %p1002_p3 = pnand %p584_p1, %p257_p2 }
  0x26   : > { %s226_s12 = scalar_lea.hbm %s1127_s1, %s596_s7  ;;  %s197_s1 = scalar_lea.vmem [#allocation2], %s576_s6 }
  0x27   : > { %s227_s13 = sshll.u32 %s226_s12, 4  ;;  %s203_s12 = scalar_lea.hbm %s1099_s0, %s596_s7  ;;  %s228_s13 = int_to_ptr.hbm [resolvable:$true] %s227_s13 }
  0x28   : > { %614 = dma.hbm_to_vmem [thread:$0]  (!%p990_p0), %s228_s13, 512, %s230_s22, %s217_s24, %s888_s25, %s888_s25, %s889_s26  }
  0x29   : > { %s204_s14 = sshll.u32 %s203_s12, 4  ;;  %s206_s29 = sshll.u32 %s197_s1, 4  ;;  %s205_s14 = int_to_ptr.hbm [resolvable:$true] %s204_s14  ;;  %s207_s29 = int_to_ptr.vmem [resolvable:$true] %s206_s29 }
  0x2a   : > { %611 = dma.hbm_to_vmem [thread:$0]  (!%p990_p0), %s205_s14, 512, %s207_s29, %s194_s9, %s888_s25, %s888_s25, %s889_s26  }
  0x2b   : > { %s582_s13 = sshll.u32 %s984_s5, 3  ;;  %s583_s22 = sshll.u32 %s882_s19, 3 }
  0x2c   : > { %s248_s30 = scalar_lea.hbm %s1101_s2, %s583_s22  ;;  %s243_s3 = scalar_lea.vmem [#allocation7], %s582_s13 }
  0x2d   : > { %s250_s15 = sshll.u32 %s248_s30, 4  ;;  %s252_s28 = sshll.u32 %s243_s3, 4  ;;  %s251_s15 = int_to_ptr.hbm [resolvable:$true] %s250_s15  ;;  %s253_s28 = int_to_ptr.vmem [resolvable:$true] %s252_s28 }
  0x2e   : > { %617 = dma.hbm_to_vmem [thread:$0]  (!%p990_p0), %s251_s15, 128, %s253_s28, %s217_s24  }
  0x2f   : > { %261 = sbr.rel (%p1002_p3) target bundleno = 85 (0x55), region = 32  ;;  %s1022_s1 = sand.u32 (!%p1002_p3), 1, %s870_s16  }
  0x30   : > { %s585_s29 = sshll.u32 (!%p1002_p3), %s1022_s1, 5  ;;  %s264_s5 = scalar_lea.sflag (!%p1002_p3), [#allocation3], %s1022_s1 }
  0x31   : > { %s267_s17 = scalar_lea.vmem (!%p1002_p3), [#allocation2], %s585_s29 }
  0x34   : > { %849 = dma.done.wait (%p966_p8), %s264_s5, 512  }
  0x35   : > { %851 = vsyncadd (%p966_p8), %s264_s5, 4294966784  ;;  %s273_s3 = sand.u32 1, %s946_s21   ;;  %s277_s20 = scalar_lea.vmem [#allocation5], %s585_s29 }
  0x36   : > { %s274_s15 = scalar_lea.sflag [#allocation6], %s273_s3 }
  0x37   : > { %853 = dma.done.wait (%p966_p8), %s274_s15, 640  }
  0x38   : > { %855 = vsyncadd (%p966_p8), %s274_s15, 4294966656  ;;  %s1036_s23 = sshll.u32 %s1022_s1, 3  ;;  %v339_v1 = vld [vmem:[%s267_s17] sm:$0xff]  ;;  %v340_v2 = vld [vmem:[%s267_s17 + $0x8] sm:$0xff]  ;;  %s592_s21 = sshll.u32 %s878_s18, 3 }
  0x39   : > { %s287_s28 = scalar_lea.vmem [#allocation7], %s1036_s23  ;;  %v341_v7 = vld [vmem:[%s267_s17 + $0x10] sm:$0xff]  ;;  %v342_v8 = vld [vmem:[%s267_s17 + $0x18] sm:$0xff]  ;;  %v343_v9 = vld [vmem:[%s277_s20] sm:$0xff]  ;;  %s410_s6 = scalar_lea.hbm %s1103_s4, %s592_s21 }
  0x3a   : > { %v347_v0 = vld [vmem:[%s287_s28] sm:$0xff]  ;;  %v345_v11 = vld [vmem:[%s277_s20 + $0x10] sm:$0xff]  ;;  %v346_v12 = vld [vmem:[%s277_s20 + $0x18] sm:$0xff]  ;;  %v356_v13 = vsub.f32 %v339_v1, %v343_v9  ;;  %s327_s18 = scalar_lea.vmem [#allocation9], %s1036_s23  ;;  %s414_s8 = sshll.u32 %s410_s6, 4  ;;  %s415_s8 = int_to_ptr.hbm [resolvable:$true] %s414_s8 }
  0x3b   : > { %v348_v3 = vunpack.c.0.s8 %v347_v0  ;;  %v349_v4 = vunpack.c.1.s8 %v347_v0  ;;  %v350_v5 = vunpack.c.2.s8 %v347_v0  ;;  %v351_v6 = vunpack.c.3.s8 %v347_v0  ;;  %v344_v10 = vld [vmem:[%s277_s20 + $0x8] sm:$0xff]  ;;  %s1044_s7 = sshll.u32 %s327_s18, 4  ;;  %s1130_s10 = sld [smem:[#allocation23_spill]]  ;;  %s413_s7 = int_to_ptr.vmem [resolvable:$true] %s1044_s7 }
  0x3c   : > { %v357_v17 = vsub.f32 %v340_v2, %v344_v10  ;;  %v358_v18 = vsub.f32 %v341_v7, %v345_v11  ;;  %v359_v19 = vsub.f32 %v342_v8, %v346_v12  ;;  %v360_v20 = vmul.f32 %v356_v13, %v356_v13  ;;  %s320_s12 = scalar_lea.vmem [#allocation8], %s1036_s23  ;;  %s386_s13 = scalar_lea.sflag [#allocation10], %s1022_s1 }
  0x3d   : > { %v352_v14 = vcvt.s32.f32 %v348_v3  ;;  %v353_v15 = vcvt.s32.f32 %v349_v4  ;;  %v354_v16 = vcvt.s32.f32 %v350_v5  ;;  %v355_v21 = vcvt.s32.f32 %v351_v6  ;;  %s1051_s14 = sshll.u32 %s320_s12, 4  ;;  %s782_s22 = sshra.s32 %s415_s8, 4  ;;  %s783_s22 = int_to_ptr.hbm [resolvable:$true] %s782_s22  ;;  %s399_s14 = int_to_ptr.vmem [resolvable:$true] %s1051_s14 }
  0x3e   : > { %v361_v23 = vmul.f32 %v357_v17, %v357_v17  ;;  %v362_v24 = vmul.f32 %v358_v18, %v358_v18  ;;  %v363_v25 = vmul.f32 %v359_v19, %v359_v19  ;;  %s784_s29 = scalar_lea.hbm %s783_s22, 8  ;;  %s788_s3 = scalar_lea.hbm %s1103_s4, 16 }
  0x3f   : > { %v375_v22 = vadd.f32 %v353_v15, %v352_v14  ;;  %v364_v26 = vmul.f32 %v360_v20, %v352_v14  ;;  %p785_p4 = scmp.ne.s32.totalorder %s783_s22, %s784_s29  ;;  %p789_p7 = scmp.lt.s32.totalorder %s783_s22, %s1103_s4 }
  0x40   : > { %v365_v28 = vmul.f32 %v361_v23, %v353_v15  ;;  %v366_v29 = vmul.f32 %v362_v24, %v354_v16  ;;  %v367_v31 = vmul.f32 %v363_v25, %v355_v21  ;;  %p790_p8 = scmp.lt.s32.totalorder %s788_s3, %s784_s29 }
  0x41   : > { %v376_v27 = vadd.f32 %v375_v22, %v354_v16  ;;  %s396_s11 = scalar_lea.hbm %s1130_s10, %s592_s21  ;;  %p786_p5 = pnand %p785_p4, %p970_p9 }
  0x42   : > { %v369_v32 = vadd.f32 %v365_v28, %v364_v26  ;;  %s400_s9 = sshll.u32 %s396_s11, 4  ;;  %p791_p10 = por %p790_p8, %p789_p7  ;;  %s401_s9 = int_to_ptr.hbm [resolvable:$true] %s400_s9 }
  0x43   : > { %v377_v30 = vadd.f32 %v376_v27, %v355_v21  ;;  %p787_p6 = pneg %p786_p5 }
  0x44   : > { %v370_v33 = vadd.f32 %v369_v32, %v366_v29 }
  0x45   : > { %379 = vst [vmem:[%s327_s18] sm:$0xff] %v377_v30  ;;  %p792_p13 = pnand %p791_p10, %p787_p6 }
  0x46   : > { %v371_v34 = vadd.f32 %v370_v33, %v367_v31 }
  0x47   : > { %795 = shalt.err (!%p792_p13)
}
  0x48   : > { %605 = dma.vmem_to_hbm [thread:$0]  (%p970_p9), %s413_s7, 128, %s415_s8, %s386_s13   ;;  %373 = vst [vmem:[%s320_s12] sm:$0xff] %v371_v34 }
  0x49   : > { %s381_s23 = scalar_lea.sflag [#allocation4], %s1022_s1  ;;  %s810_s28 = sshra.s32 %s401_s9, 4  ;;  %s811_s28 = int_to_ptr.hbm [resolvable:$true] %s810_s28 }
  0x4a   : > { %s812_s21 = scalar_lea.hbm %s811_s28, 8  ;;  %s816_s6 = scalar_lea.hbm %s1130_s10, 16 }
  0x4b   : > { %p813_p0 = scmp.ne.s32.totalorder %s811_s28, %s812_s21  ;;  %p817_p3 = scmp.lt.s32.totalorder %s811_s28, %s1130_s10 }
  0x4c   : > { %p818_p4 = scmp.lt.s32.totalorder %s816_s6, %s812_s21 }
  0x4d   : > { %p814_p1 = pnand %p813_p0, %p970_p9 }
  0x4e   : > { %p819_p5 = por %p818_p4, %p817_p3 }
  0x4f   : > { %p815_p2 = pneg %p814_p1 }
  0x51   : > { %p820_p6 = pnand %p819_p5, %p815_p2 }
  0x53   : > { %823 = shalt.err (!%p820_p6)
}
  0x54   : > { %604 = dma.vmem_to_hbm [thread:$0]  (%p970_p9), %s399_s14, 128, %s401_s9, %s381_s23  }
  0x55 PF: > { %s1131_s1 = sld [smem:[#allocation15_spill]]  ;;  %p619_p7 = pnand %p575_p12, %p977_p11 }
  0x56   : > { %s1133_s8 = sld [smem:[#allocation17_spill]] }
  0x57   : > { %p620_p8 = pneg %p619_p7 }
  0x5b   : > { %s426_s26 = sand.u32 1, %s1131_s1  }
  0x5c   : > { %s427_s11 = scalar_lea.sflag [#allocation4], %s426_s26 }
  0x5d   : > { %857 = dma.done.wait (%p620_p8), %s427_s11, 128  }
  0x5e   : > { %859 = vsyncadd (%p620_p8), %s427_s11, 4294967168  ;;  %s437_s12 = scalar_lea.sflag [#allocation10], %s426_s26 }
  0x5f   : > { %861 = dma.done.wait (%p620_p8), %s437_s12, 128  }
  0x60   : > { %863 = vsyncadd (%p620_p8), %s437_s12, 4294967168  ;;  %s27_s20 = sadd.s32 1, %s1133_s8   ;;  %s1134_s24 = sld [smem:[#allocation16_spill]] }
  0x61   : > { %p24_p10 = scmp.ge.s32.totalorder %s27_s20, 4   ;;  %s1135_s17 = sld [smem:[#allocation20_spill]] }
  0x62   : > { %s1136_s14 = sld [smem:[#allocation18_spill]]  ;;  %s1137_s15 = smov %s870_s16 }
  0x63   : > { %s1139_s18 = smov %s882_s19 }
  0x64   :  { %26 = sbr.rel (!%p24_p10) target bundleno = 13 (0xd), region = 122 }
  0x66   : > { %s1138_s16 = smov %s1134_s24 }
  0x68   : > { %s1140_s19 = smov %s1136_s14 }
  0x69   :  { %443 = vsyncpa [#allocation3], 1 }
  0x6a   :  { %445 = vsyncpa [#allocation3 + $0x1], 1 }
  0x6b   :  { %446 = vsyncpa [#allocation6], 1 }
  0x6c   :  { %448 = vsyncpa [#allocation6 + $0x1], 1 }
  0x6d   :  { %449 = vsyncpa [#allocation4], 1 }
  0x6e   :  { %451 = vsyncpa [#allocation4 + $0x1], 1 }
  0x6f   :  { %452 = vsyncpa [#allocation10], 1 }
  0x70   :  { %454 = vsyncpa [#allocation10 + $0x1], 1 }

</bundles_post_ra>
